<compile_context>
chip_gen: v6e
topology: v6e:2x2x1
jax: 0.10.0
libtpu: 0.0.40
codegen_flags: <defaults>
</compile_context>

<pallas_src>
import jax
import jax.numpy as jnp
from jax.experimental import pallas as pl
from jax.experimental.pallas import tpu as pltpu

EPS = 1e-5


# ----------------------------- small helpers -----------------------------
def _round_up(v, m):
    return (v + m - 1) // m * m


def _pick_tile(rows, max_tile, *, mult=8, min_steps=8):
    """Largest tile (multiple of `mult`, <= max_tile) that keeps >= min_steps grid steps."""
    t = _round_up(max(1, pl.cdiv(rows, min_steps)), mult)
    t = min(t, _round_up(max_tile, mult))
    return max(mult, t)


def _fold_bn(w, bn):
    """Fold inference-mode BatchNorm1d into a bias-free linear weight."""
    gamma, beta, mean, var = bn
    scale = gamma * jax.lax.rsqrt(var + EPS)               # (out,)
    w_fold = (w * scale[None, :]).astype(jnp.float32)      # (cin, out)
    shift = (beta - mean * scale).reshape(1, -1).astype(jnp.float32)
    return w_fold, shift


# ----------------------------- Pallas kernels -----------------------------
def _group_kernel(g_ref, w_ref, shift_ref, o_ref):
    """Fused Linear + folded-BN + ReLU + neighbor max-pool.

    g_ref     : (ns, tm, cin_pad)  neighbor-major grouped features (bf16)
    w_ref     : (cin_pad, out)     BN-folded weight (bf16)
    shift_ref : (1, out)           BN-folded shift (f32)
    o_ref     : (tm, out)          pooled output (f32)
    """
    ns, tm, cin_p = g_ref.shape
    out = o_ref.shape[-1]
    g = g_ref[...].reshape(ns * tm, cin_p)                  # leading-dim merge: free view
    h = jnp.dot(g, w_ref[...], preferred_element_type=jnp.float32)
    h = jnp.maximum(h + shift_ref[...], 0.0)                # ReLU commutes with max
    # Leading-axis max -> plain VPU vmax chain over full (tm, out) tiles.
    o_ref[...] = jnp.max(h.reshape(ns, tm, out), axis=0).astype(o_ref.dtype)


def _linear_kernel(x_ref, w_ref, shift_ref, o_ref):
    """Fused Linear + folded-BN + ReLU (stride == 1 branch), lane-dense blocks."""
    h = jnp.dot(x_ref[...], w_ref[...], preferred_element_type=jnp.float32)
    o_ref[...] = jnp.maximum(h + shift_ref[...], 0.0).astype(o_ref.dtype)


# ----------------------------- Pallas wrappers -----------------------------
def grouped_linear_bn_relu_pool(p, x, new_p, idx, w, bn, *, tm=512,
                                grouped_dtype=jnp.bfloat16):
    """(p, x, new_p, idx) -> (M, out_planes): gather + Linear + BN + ReLU + max-pool.

    tm=512 keeps the per-step working set ~9 MiB (v5e 16 MiB scoped-VMEM safe);
    on v6e/v7x tm=1024 also fits the 32 MiB scoped default.
    """
    m, ns = idx.shape
    c = x.shape[1]
    cin = 3 + c
    out = w.shape[1]
    cin_p = _round_up(cin, 8)

    w_fold, shift = _fold_bn(w, bn)
    # zero rows for padded channels (mathematical no-op), bf16 for the MXU
    w_fold = jnp.pad(w_fold, ((0, cin_p - cin), (0, 0))).astype(grouped_dtype)

    tm = _pick_tile(m, tm, mult=16)                         # mult=16: bf16 sublane packing
    m_pad = pl.cdiv(m, tm) * tm

    # Neighbor-major slab, born at its final padded shape (no separate pad passes):
    idx_t = idx.T                                           # (ns, M)
    if m_pad != m:
        idx_t = jnp.pad(idx_t, ((0, 0), (0, m_pad - m)))    # pad rows with index 0 (valid)
        new_p = jnp.pad(new_p, ((0, m_pad - m), (0, 0)))
    rel = p[idx_t] - new_p[None, :, :]                      # (ns, m_pad, 3)
    feat = x[idx_t]                                         # (ns, m_pad, C)
    zpad = jnp.zeros((ns, m_pad, cin_p - cin), x.dtype)
    grouped = jnp.concatenate([rel, feat, zpad], axis=-1).astype(grouped_dtype)

    flops = 2 * m_pad * ns * cin_p * out
    bytes_accessed = (grouped.size * grouped.dtype.itemsize
                      + w_fold.size * w_fold.dtype.itemsize
                      + shift.size * shift.dtype.itemsize
                      + m_pad * out * 4)

    res = pl.pallas_call(
        _group_kernel,
        out_shape=jax.ShapeDtypeStruct((m_pad, out), jnp.float32),
        grid=(m_pad // tm,),
        in_specs=[
            pl.BlockSpec((ns, tm, cin_p), lambda i: (0, i, 0)),
            pl.BlockSpec((cin_p, out), lambda i: (0, 0)),
            pl.BlockSpec((1, out), lambda i: (0, 0)),
        ],
        out_specs=pl.BlockSpec((tm, out), lambda i: (i, 0)),
        compiler_params=pltpu.CompilerParams(dimension_semantics=("parallel",)),
        cost_estimate=pl.CostEstimate(flops=int(flops), transcendentals=0,
                                      bytes_accessed=int(bytes_accessed)),
    )(grouped, w_fold, shift)
    return res[:m]                                          # keep: padded rows = relu(shift)


def linear_bn_relu(x, w, bn, *, tm_points=4096):
    """x: (N, cin) -> (N, out_planes). Lane-dense via block-diagonal weight when possible."""
    n, cin = x.shape
    out = w.shape[1]
    w_fold, shift = _fold_bn(w, bn)

    # Pack r input rows per 128-lane row (free row-major view) and use a block-diagonal
    # weight so loads/stores are fully dense and the MXU K dim is filled to 128.
    r = 128 // cin if 128 % cin == 0 else 1
    if r > 1:
        w_blk = jnp.kron(jnp.eye(r, dtype=w_fold.dtype), w_fold)   # (r*cin, r*out)
        shift_blk = jnp.tile(shift, (1, r))                        # (1, r*out)
    else:
        w_blk, shift_blk = w_fold, shift

    rows = pl.cdiv(n, r)
    tm_r = _pick_tile(rows, max(8, tm_points // r), mult=8)
    rows_pad = pl.cdiv(rows, tm_r) * tm_r
    n_pad = rows_pad * r
    xp = jnp.pad(x, ((0, n_pad - n), (0, 0))) if n_pad != n else x
    x2 = xp.reshape(rows_pad, r * cin)                             # free row-major view

    flops = 2 * rows_pad * (r * cin) * (r * out)
    bytes_accessed = (x2.size * 4 + w_blk.size * 4 + shift_blk.size * 4
                      + rows_pad * r * out * 4)

    res = pl.pallas_call(
        _linear_kernel,
        out_shape=jax.ShapeDtypeStruct((rows_pad, r * out), x.dtype),
        grid=(rows_pad // tm_r,),
        in_specs=[
            pl.BlockSpec((tm_r, r * cin), lambda i: (i, 0)),
            pl.BlockSpec((r * cin, r * out), lambda i: (0, 0)),
            pl.BlockSpec((1, r * out), lambda i: (0, 0)),
        ],
        out_specs=pl.BlockSpec((tm_r, r * out), lambda i: (i, 0)),
        compiler_params=pltpu.CompilerParams(dimension_semantics=("parallel",)),
        cost_estimate=pl.CostEstimate(flops=int(flops), transcendentals=0,
                                      bytes_accessed=int(bytes_accessed)),
    )(x2, w_blk, shift_blk)
    return res.reshape(n_pad, out)[:n]                             # keep the [:n] slice


# ----------------------------- FPS / KNN glue (plain JAX) -----------------------------
# TODO(synk): pointops FPS / knn_query_and_group are offset-aware (per-batch); implemented
#             here for a single batch (o = [N]) only, as data-dependent plain-JAX glue.
def farthest_point_sampling(p, m):
    n = p.shape[0]

    def body(i, state):
        idx, dists = state
        last = idx[i - 1]
        d = jnp.sum((p - p[last]) ** 2, axis=-1)
        dists = jnp.minimum(dists, d)
        idx = idx.at[i].set(jnp.argmax(dists).astype(jnp.int32))
        return idx, dists

    idx0 = jnp.zeros((m,), jnp.int32)
    dists0 = jnp.full((n,), jnp.inf, jnp.float32)
    idx, _ = jax.lax.fori_loop(1, m, body, (idx0, dists0))
    return idx


def knn_indices(p, new_p, nsample):
    d2 = jnp.sum((new_p[:, None, :] - p[None, :, :]) ** 2, axis=-1)   # (M, N)
    _, idx = jax.lax.top_k(-d2, nsample)                              # (M, nsample)
    return idx


# ----------------------------- TransitionDown forward -----------------------------
def transition_down_forward(p, x, o, params, *, stride, nsample,
                            tm_group=512, tm_linear=4096):
    if stride != 1:
        n = x.shape[0]
        m = n // stride
        idx_fps = farthest_point_sampling(p, m)
        n_p = p[idx_fps]
        knn_idx = knn_indices(p, n_p, nsample)
        x_out = grouped_linear_bn_relu_pool(p, x, n_p, knn_idx,
                                            params['w'], params['bn'], tm=tm_group)
        n_o = jnp.array([m], jnp.int32)
        return n_p, x_out, n_o
    else:
        x_out = linear_bn_relu(x, params['w'], params['bn'], tm_points=tm_linear)
        return p, x_out, o


# ----------------------------- pure-JAX reference -----------------------------
def reference_forward(p, x, o, params, *, stride, nsample):
    w = params['w']
    gamma, beta, mean, var = params['bn']

    def bn_relu(h):
        return jnp.maximum((h - mean) * jax.lax.rsqrt(var + EPS) * gamma + beta, 0.0)

    if stride != 1:
        n = x.shape[0]
        m = n // stride
        idx = farthest_point_sampling(p, m)
        n_p = p[idx]
        knn = knn_indices(p, n_p, nsample)
        rel = p[knn] - n_p[:, None, :]                                # (M, ns, 3)
        g = jnp.concatenate([rel, x[knn]], axis=-1)                   # (M, ns, 3+C)
        h = bn_relu(jnp.einsum('mnc,co->mno', g, w))                  # (M, ns, out)
        return n_p, jnp.max(h, axis=1), jnp.array([m], jnp.int32)
    else:
        return p, bn_relu(x @ w), o


if __name__ == "__main__":
    in_planes, out_planes, nsample, stride = 16, 32, 16, 4
    N = 1024

    key = jax.random.PRNGKey(0)
    ks = jax.random.split(key, 8)
    p = jax.random.normal(ks[0], (N, 3), jnp.float32)
    x = jax.random.normal(ks[1], (N, in_planes), jnp.float32)
    o = jnp.array([N], jnp.int32)                                     # single-batch offsets

    def init(k, shape, scale=0.2):
        return (scale * jax.random.normal(k, shape)).astype(jnp.float32)

    def bn_params(k):
        k1, k2, k3, k4 = jax.random.split(k, 4)
        gamma = (1.0 + 0.1 * jax.random.normal(k1, (out_planes,))).astype(jnp.float32)
        beta = (0.1 * jax.random.normal(k2, (out_planes,))).astype(jnp.float32)
        mean = (0.1 * jax.random.normal(k3, (out_planes,))).astype(jnp.float32)
        var = (0.5 + jax.random.uniform(k4, (out_planes,))).astype(jnp.float32)
        return gamma, beta, mean, var

    # ---- stride != 1: FPS + KNN + fused gather-slab linear/BN/ReLU/maxpool kernel ----
    params_s = {'w': init(ks[2], (3 + in_planes, out_planes)), 'bn': bn_params(ks[3])}
    n_p, x_s, n_o = transition_down_forward(p, x, o, params_s, stride=stride, nsample=nsample)
    x_s = jax.block_until_ready(x_s)
    rp, rx, ro = reference_forward(p, x, o, params_s, stride=stride, nsample=nsample)
    assert x_s.shape == (N // stride, out_planes)
    assert jnp.allclose(n_p, rp)
    assert int(n_o[0]) == int(ro[0])
    # grouped slab is bf16 (f32 accumulation) -> slightly wider tolerance than pure f32
    assert jnp.allclose(x_s, rx, rtol=2e-2, atol=2e-2), float(jnp.max(jnp.abs(x_s - rx)))

    # ---- stride == 1: lane-dense fused linear/BN/ReLU kernel ----
    params_1 = {'w': init(ks[4], (in_planes, out_planes)), 'bn': bn_params(ks[5])}
    p1, x_1, o1 = transition_down_forward(p, x, o, params_1, stride=1, nsample=nsample)
    x_1 = jax.block_until_ready(x_1)
    _, rx1, _ = reference_forward(p, x, o, params_1, stride=1, nsample=nsample)
    assert x_1.shape == (N, out_planes)
    assert jnp.allclose(x_1, rx1, rtol=1e-2, atol=1e-2), float(jnp.max(jnp.abs(x_1 - rx1)))

    print("KERNEL_OK")
</pallas_src>

<mosaic_0001>
module attributes {stable_mosaic.version = 11 : i64} {
  func.func @_group_kernel(%arg0: i32, %arg1: memref<16x32x24xbf16, #tpu.memory_space<vmem>>, %arg2: memref<24x32xbf16, #tpu.memory_space<vmem>>, %arg3: memref<1x32xf32, #tpu.memory_space<vmem>>, %arg4: memref<32x32xf32, #tpu.memory_space<vmem>>) attributes {dimension_semantics = [#tpu.dimension_semantics<parallel>], iteration_bounds = array<i64: 8>, scalar_prefetch = 0 : i64, scratch_operands = 0 : i64, tpu.core_type = #tpu.core_type<tc>, window_params = [{transform_indices = @transform_0, window_bounds = array<i64: 16, 32, 24>}, {pipeline_mode = #tpu.pipeline_mode<synchronous>, transform_indices = @transform_1, window_bounds = array<i64: 24, 32>}, {pipeline_mode = #tpu.pipeline_mode<synchronous>, transform_indices = @transform_2, window_bounds = array<i64: 1, 32>}, {transform_indices = @transform_3, window_bounds = array<i64: 32, 32>}]} {
    %c0 = arith.constant 0 : index
    %c0_0 = arith.constant 0 : index
    %c0_1 = arith.constant 0 : index
    %0 = vector.load %arg1[%c0, %c0_0, %c0_1] : memref<16x32x24xbf16, #tpu.memory_space<vmem>>, vector<16x32x24xbf16>
    %1 = vector.shape_cast %0 : vector<16x32x24xbf16> to vector<512x24xbf16>
    %c0_2 = arith.constant 0 : index
    %c0_3 = arith.constant 0 : index
    %2 = vector.load %arg2[%c0_2, %c0_3] : memref<24x32xbf16, #tpu.memory_space<vmem>>, vector<24x32xbf16>
    %cst = arith.constant dense<0.000000e+00> : vector<512x32xf32>
    %3 = tpu.matmul %1, %2, %cst {dimension_numbers = #tpu.dot_dimension_numbers<[1], [0], [0], [1], [0, 0, 1, 1], [], []>} : vector<512x24xbf16>, vector<24x32xbf16>, vector<512x32xf32> -> vector<512x32xf32>
    %c0_4 = arith.constant 0 : index
    %c0_5 = arith.constant 0 : index
    %4 = vector.load %arg3[%c0_4, %c0_5] : memref<1x32xf32, #tpu.memory_space<vmem>>, vector<1x32xf32>
    %5 = vector.broadcast %4 : vector<1x32xf32> to vector<512x32xf32>
    %6 = arith.addf %3, %5 : vector<512x32xf32>
    %cst_6 = arith.constant 0.000000e+00 : f32
    %7 = vector.broadcast %cst_6 : f32 to vector<512x32xf32>
    %8 = arith.maximumf %6, %7 : vector<512x32xf32>
    %9 = vector.shape_cast %8 : vector<512x32xf32> to vector<16x32x32xf32>
    %cst_7 = arith.constant dense<0xFF800000> : vector<32x32xf32>
    %10 = vector.multi_reduction <maximumf>, %9, %cst_7 [0] : vector<16x32x32xf32> to vector<32x32xf32>
    %c0_8 = arith.constant 0 : index
    %c0_9 = arith.constant 0 : index
    %11 = vector.load %arg4[%c0_8, %c0_9] : memref<32x32xf32, #tpu.memory_space<vmem>>, vector<32x32xf32>
    tpu.vector_store %arg4[%c0_8, %c0_9], %10 {strides = array<i32>} : memref<32x32xf32, #tpu.memory_space<vmem>>, vector<32x32xf32>,
    return
  }
  func.func @transform_0(%arg0: i32) -> (i32, i32, i32) {
    %c0_i32 = arith.constant 0 : i32
    %c0_i32_0 = arith.constant 0 : i32
    %c0_i32_1 = arith.constant 0 : i32
    return %c0_i32, %arg0, %c0_i32_0 : i32, i32, i32
  }
  func.func @transform_1(%arg0: i32) -> (i32, i32) {
    %c0_i32 = arith.constant 0 : i32
    %c0_i32_0 = arith.constant 0 : i32
    %c0_i32_1 = arith.constant 0 : i32
    return %c0_i32, %c0_i32_0 : i32, i32
  }
  func.func @transform_2(%arg0: i32) -> (i32, i32) {
    %c0_i32 = arith.constant 0 : i32
    %c0_i32_0 = arith.constant 0 : i32
    %c0_i32_1 = arith.constant 0 : i32
    return %c0_i32, %c0_i32_0 : i32, i32
  }
  func.func @transform_3(%arg0: i32) -> (i32, i32) {
    %c0_i32 = arith.constant 0 : i32
    %c0_i32_0 = arith.constant 0 : i32
    return %arg0, %c0_i32 : i32, i32
  }
}

</mosaic_0001>

<bundles_post_ra>
// kernel: tpu_custom_call.1
= control target key start
LH: loop header
LB: loop body
LE: loop exit
PB: predicated region body
PF: predicated region fallthrough
CT: control target
= control target key end

     0   :  { %s1649_s12 = smov 0   ;;  %s1651_s13 = smov 0   ;;  %s2095_s0 = inlined_call_operand.vmem [shape: bf16[16,256,24], index: 0, kind: input, shape index: {}]   ;;  %s2096_s1 = inlined_call_operand.vmem [shape: bf16[24,32], index: 1, kind: input, shape index: {}]   ;;  %s2097_s2 = inlined_call_operand.vmem [shape: f32[1,32], index: 2, kind: input, shape index: {}]   ;;  %s2098_s3 = inlined_call_operand.vmem [shape: f32[256,32], index: 3, kind: output, shape index: {}]  }
   0x1   :  { %s1653_s14 = smov 0  }
   0x2 LB: > { %s1358_s15 = sadd.s32 4294967295, %s1627_s14   ;;  %s1666_s16 = sadd.s32 1, %s1627_s14   ;;  %s1627_s14 = sphi %s1653_s14, %s2101_s14   ;;  %s1623_s13 = sphi %s1651_s13, %s2100_s13   ;;  %s1619_s12 = sphi %s1649_s12, %s2099_s12  }
   0x3   : > { %s17_s17 = ssub.s32 %s1627_s14, %s1666_s16  ;;  %s20_s18 = sadd.s32 1, %s1623_s13 }
   0x4   : > { %p18_p0 = scmp.eq.s32.totalorder %s17_s17, 0  ;;  %p27_p1 = scmp.ne.s32.totalorder %s1623_s13, %s1619_s12 }
   0x5   : > { %p28_p2 = scmp.eq.s32.totalorder %s1627_s14, 0  ;;  %p1361_p4 = scmp.ge.s32.totalorder %s1627_s14, 8 }
   0x6   : > { %s1675_s19 = scalar_select %p18_p0, %s1623_s13, %s20_s18  }
   0x7   : > { %p29_p3 = por %p28_p2, %p27_p1  ;;  %127 = sbr.rel (%p1361_p4) target bundleno = 32 (0x20), region = 24 }
   0xc   : > { %130 = sbr.rel (!%p29_p3) target bundleno = 32 (0x20), region = 28  ;;  %s132_s20 = sand.u32 (%p29_p3), 1, %s1623_s13  }
   0xd   : > { %s1438_s21 = sshll.u32 (%p29_p3), %s1627_s14, 4  ;;  %s1362_s22 = sshll.u32 (%p29_p3), %s132_s20, 8 }
   0xe   : > { %s1683_s25 = scalar_lea.vmem (%p29_p3), %s2095_s0, %s1438_s21  ;;  %s1688_s26 = scalar_lea.vmem (%p29_p3), [#allocation2], %s1362_s22 }
   0xf   : > { %v154_v0 = vld [vmem:[%s1683_s25] sm:$0xff] (%p29_p3)   ;;  %v158_v1 = vld [vmem:[%s1683_s25 + $0x8] sm:$0xff] (%p29_p3)  }
  0x10   : > { %v162_v2 = vld [vmem:[%s1683_s25 + $0x80] sm:$0xff] (%p29_p3)   ;;  %155 = vst [vmem:[%s1688_s26] sm:$0xff] (%p29_p3), %v154_v0   ;;  %159 = vst [vmem:[%s1688_s26 + $0x8] sm:$0xff] (%p29_p3), %v158_v1   ;;  %v166_v3 = vld [vmem:[%s1683_s25 + $0x88] sm:$0xff] (%p29_p3)  }
  0x11   : > { %163 = vst [vmem:[%s1688_s26 + $0x10] sm:$0xff] %v162_v2   ;;  %v170_v4 = vld [vmem:[%s1683_s25 + $0x100] sm:$0xff]   ;;  %v174_v5 = vld [vmem:[%s1683_s25 + $0x108] sm:$0xff]   ;;  %167 = vst [vmem:[%s1688_s26 + $0x18] sm:$0xff] %v166_v3  }
  0x12   : > { %171 = vst [vmem:[%s1688_s26 + $0x20] sm:$0xff] %v170_v4   ;;  %175 = vst [vmem:[%s1688_s26 + $0x28] sm:$0xff] %v174_v5   ;;  %v178_v6 = vld [vmem:[%s1683_s25 + $0x180] sm:$0xff]   ;;  %v182_v7 = vld [vmem:[%s1683_s25 + $0x188] sm:$0xff]  }
  0x13   : > { %v186_v8 = vld [vmem:[%s1683_s25 + $0x200] sm:$0xff]   ;;  %179 = vst [vmem:[%s1688_s26 + $0x30] sm:$0xff] %v178_v6   ;;  %183 = vst [vmem:[%s1688_s26 + $0x38] sm:$0xff] %v182_v7   ;;  %v190_v9 = vld [vmem:[%s1683_s25 + $0x208] sm:$0xff]  }
  0x14   : > { %187 = vst [vmem:[%s1688_s26 + $0x40] sm:$0xff] %v186_v8   ;;  %v194_v10 = vld [vmem:[%s1683_s25 + $0x280] sm:$0xff]   ;;  %v198_v11 = vld [vmem:[%s1683_s25 + $0x288] sm:$0xff]   ;;  %191 = vst [vmem:[%s1688_s26 + $0x48] sm:$0xff] %v190_v9  }
  0x15   : > { %195 = vst [vmem:[%s1688_s26 + $0x50] sm:$0xff] %v194_v10   ;;  %199 = vst [vmem:[%s1688_s26 + $0x58] sm:$0xff] %v198_v11   ;;  %v202_v12 = vld [vmem:[%s1683_s25 + $0x300] sm:$0xff]   ;;  %v206_v13 = vld [vmem:[%s1683_s25 + $0x308] sm:$0xff]  }
  0x16   : > { %v210_v14 = vld [vmem:[%s1683_s25 + $0x380] sm:$0xff]   ;;  %203 = vst [vmem:[%s1688_s26 + $0x60] sm:$0xff] %v202_v12   ;;  %207 = vst [vmem:[%s1688_s26 + $0x68] sm:$0xff] %v206_v13   ;;  %v214_v15 = vld [vmem:[%s1683_s25 + $0x388] sm:$0xff]  }
  0x17   : > { %211 = vst [vmem:[%s1688_s26 + $0x70] sm:$0xff] %v210_v14   ;;  %v218_v16 = vld [vmem:[%s1683_s25 + $0x400] sm:$0xff]   ;;  %v222_v17 = vld [vmem:[%s1683_s25 + $0x408] sm:$0xff]   ;;  %215 = vst [vmem:[%s1688_s26 + $0x78] sm:$0xff] %v214_v15  }
  0x18   : > { %219 = vst [vmem:[%s1688_s26 + $0x80] sm:$0xff] %v218_v16   ;;  %223 = vst [vmem:[%s1688_s26 + $0x88] sm:$0xff] %v222_v17   ;;  %v226_v18 = vld [vmem:[%s1683_s25 + $0x480] sm:$0xff]   ;;  %v230_v19 = vld [vmem:[%s1683_s25 + $0x488] sm:$0xff]  }
  0x19   : > { %v234_v20 = vld [vmem:[%s1683_s25 + $0x500] sm:$0xff]   ;;  %227 = vst [vmem:[%s1688_s26 + $0x90] sm:$0xff] %v226_v18   ;;  %231 = vst [vmem:[%s1688_s26 + $0x98] sm:$0xff] %v230_v19   ;;  %v238_v21 = vld [vmem:[%s1683_s25 + $0x508] sm:$0xff]  }
  0x1a   : > { %235 = vst [vmem:[%s1688_s26 + $0xa0] sm:$0xff] %v234_v20   ;;  %v242_v22 = vld [vmem:[%s1683_s25 + $0x580] sm:$0xff]   ;;  %v246_v23 = vld [vmem:[%s1683_s25 + $0x588] sm:$0xff]   ;;  %239 = vst [vmem:[%s1688_s26 + $0xa8] sm:$0xff] %v238_v21  }
  0x1b   : > { %243 = vst [vmem:[%s1688_s26 + $0xb0] sm:$0xff] %v242_v22   ;;  %247 = vst [vmem:[%s1688_s26 + $0xb8] sm:$0xff] %v246_v23   ;;  %v250_v24 = vld [vmem:[%s1683_s25 + $0x600] sm:$0xff]   ;;  %v254_v25 = vld [vmem:[%s1683_s25 + $0x608] sm:$0xff]  }
  0x1c   : > { %v258_v26 = vld [vmem:[%s1683_s25 + $0x680] sm:$0xff]   ;;  %251 = vst [vmem:[%s1688_s26 + $0xc0] sm:$0xff] %v250_v24   ;;  %255 = vst [vmem:[%s1688_s26 + $0xc8] sm:$0xff] %v254_v25   ;;  %v262_v27 = vld [vmem:[%s1683_s25 + $0x688] sm:$0xff]  }
  0x1d   : > { %259 = vst [vmem:[%s1688_s26 + $0xd0] sm:$0xff] %v258_v26   ;;  %v266_v28 = vld [vmem:[%s1683_s25 + $0x700] sm:$0xff]   ;;  %v270_v29 = vld [vmem:[%s1683_s25 + $0x708] sm:$0xff]   ;;  %263 = vst [vmem:[%s1688_s26 + $0xd8] sm:$0xff] %v262_v27  }
  0x1e   : > { %267 = vst [vmem:[%s1688_s26 + $0xe0] sm:$0xff] %v266_v28   ;;  %271 = vst [vmem:[%s1688_s26 + $0xe8] sm:$0xff] %v270_v29   ;;  %v274_v30 = vld [vmem:[%s1683_s25 + $0x780] sm:$0xff]   ;;  %v278_v31 = vld [vmem:[%s1683_s25 + $0x788] sm:$0xff]  }
  0x1f   : > { %275 = vst [vmem:[%s1688_s26 + $0xf0] sm:$0xff] %v274_v30   ;;  %279 = vst [vmem:[%s1688_s26 + $0xf8] sm:$0xff] %v278_v31  }
  0x20 PF: > { %p1365_p5 = scmp.ge.s32.totalorder %s1627_s14, 1  ;;  %p432_p6 = scmp.lt.s32.totalorder %s1627_s14, 9 }
  0x22   : > { %p433_p7 = pnand %p1365_p5, %p432_p6 }
  0x23   : > { %s439_s4 = sand.u32 (!%p433_p7), 1, %s1619_s12   ;;  %s2019_s9 = sshll.u32 (!%p433_p7), %s1358_s15, 2 }
  0x24   : > { %436 = sbr.rel (%p433_p7) target bundleno = 329 (0x149), region = 69  ;;  %s1366_s5 = sshll.u32 (!%p433_p7), %s439_s4, 8 }
  0x25   : > { %s1760_s6 = scalar_lea.vmem (!%p433_p7), [#allocation2], %s1366_s5  ;;  %p464_p8 = scmp.lt.s32.totalorder (!%p433_p7), %s2019_s9, 31 }
  0x29   : > { %v1571_v32 = vld [vmem:[%s2096_s1 + $0x8] ss:$0 sps:$4 sm:$0xff]   ;;  %vm810_vm0 = vcmask 1043456   ;;  %v1572_v33 = vld [vmem:[%s2096_s1] sm:$0xff]   ;;  %vm713_vm1 = vcmask 195584   ;;  %v1575_v37 = vld [vmem:[%s1760_s6 + $0x10] sm:$0xff]  }
  0x2a   : > { %1545 = vmatprep.subr.msk.bf16.mxu0 %vm810_vm0, %v1571_v32  ;;  %v812_v34 = vsel %vm810_vm0, %v1571_v32, 0  ;;  %1546 = vmatprep.subr.msk.bf16.mxu1 %vm810_vm0, %v1571_v32  ;;  %v1573_v35 = vld [vmem:[%s1760_s6] sm:$0xff]   ;;  %v1574_v36 = vld [vmem:[%s1760_s6 + $0x8] sm:$0xff]   ;;  %v1581_v40 = vld [vmem:[%s1760_s6 + $0x90] sm:$0xff]   ;;  %vm1167_vm2 = vcmask 261120   ;;  %s2103_s9 = smov (!%p464_p8, %s2019_s9), 31 }
  0x2b   : > { %1474 = vmatpush3.bf16.msra.mxu0 %v812_v34  ;;  %1543 = vmatpush3.bf16.msra.mxu1 %v812_v34  ;;  %v1577_v38 = vld [vmem:[%s1760_s6 + $0x80] sm:$0xff]   ;;  %v1578_v39 = vld [vmem:[%s1760_s6 + $0x88] sm:$0xff]   ;;  %v1576_v41 = vld [vmem:[%s1760_s6 + $0x18] sm:$0xff]   ;;  %s1368_s10 = sshll.u32 %s2103_s9, 3 }
  0x2c   : > { %1475 = vmatprep.subr.bf16.mxu0 %v1572_v33  ;;  %1542 = vmatprep.subr.bf16.mxu1 %v1572_v33  ;;  %v1579_v42 = vld [vmem:[%s1760_s6 + $0x20] sm:$0xff]   ;;  %v1582_v43 = vld [vmem:[%s1760_s6 + $0x98] sm:$0xff]   ;;  %v1580_v45 = vld [vmem:[%s1760_s6 + $0x28] sm:$0xff]   ;;  %s467_s14 = scalar_lea.vmem %s2098_s3, %s1368_s10 }
  0x2d   : > { %1477 = vmatprep.mubr.msk.bf16.mxu0 %vm713_vm1, %v1573_v35  ;;  %1509 = vmatprep.mubr.msk.bf16.mxu1 %vm713_vm1, %v1577_v38  ;;  %v1585_v44 = vld [vmem:[%s1760_s6 + $0xa0] sm:$0xff]   ;;  %v1583_v46 = vld [vmem:[%s1760_s6 + $0x30] sm:$0xff]   ;;  %v1586_v47 = vld [vmem:[%s1760_s6 + $0xa8] sm:$0xff]  }
  0x2e   : > { %v1589_v48 = vld [vmem:[%s1760_s6 + $0xb0] sm:$0xff]   ;;  %v1584_v49 = vld [vmem:[%s1760_s6 + $0x38] sm:$0xff]   ;;  %v1587_v50 = vld [vmem:[%s1760_s6 + $0x40] sm:$0xff]  }
  0x2f   : > { %1476 = vmatpush3.bf16.msra.mxu0 %v1572_v33  ;;  %1544 = vmatpush3.bf16.msra.mxu1 %v1572_v33  ;;  %v1590_v51 = vld [vmem:[%s1760_s6 + $0xb8] sm:$0xff]   ;;  %v1593_v52 = vld [vmem:[%s1760_s6 + $0xc0] sm:$0xff]   ;;  %v1588_v53 = vld [vmem:[%s1760_s6 + $0x48] sm:$0xff]  }
  0x30   : > { %v1591_v54 = vld [vmem:[%s1760_s6 + $0x50] sm:$0xff]   ;;  %v1594_v55 = vld [vmem:[%s1760_s6 + $0xc8] sm:$0xff]   ;;  %v1592_v57 = vld [vmem:[%s1760_s6 + $0x58] sm:$0xff]  }
  0x31   : > { %v1597_v56 = vld [vmem:[%s1760_s6 + $0xd0] sm:$0xff]   ;;  %v1595_v58 = vld [vmem:[%s1760_s6 + $0x60] sm:$0xff]   ;;  %v1598_v59 = vld [vmem:[%s1760_s6 + $0xd8] sm:$0xff]  }
  0x32   : > { %1478 = vmatmul.mubr.msk.bf16.vlgmr.msra.gmra.mxu0 %vm713_vm1, %v1574_v36  ;;  %1510 = vmatmul.mubr.msk.bf16.vlgmr.msra.gmra.mxu1 %vm713_vm1, %v1578_v39  ;;  %v1601_v60 = vld [vmem:[%s1760_s6 + $0xe0] sm:$0xff]   ;;  %v1596_v61 = vld [vmem:[%s1760_s6 + $0x68] sm:$0xff]   ;;  %v1599_v62 = vld [vmem:[%s1760_s6 + $0x70] sm:$0xff]  }
  0x33   : > { %1481 = vmatprep.mubr.msk.bf16.mxu0 %vm713_vm1, %v1575_v37  ;;  %1513 = vmatprep.mubr.msk.bf16.mxu1 %vm713_vm1, %v1581_v40  ;;  %v1602_v63 = vld [vmem:[%s1760_s6 + $0xe8] sm:$0xff]   ;;  %v1603_v0 = vld [vmem:[%s1760_s6 + $0xf0] sm:$0xff]   ;;  %v1600_v1 = vld [vmem:[%s1760_s6 + $0x78] sm:$0xff]  }
  0x34   : > { %v1604_v2 = vld [vmem:[%s1760_s6 + $0xf8] sm:$0xff]   ;;  %v1829_v15 = vld [vmem:[%s2097_s2] ss:$0 sm:$0xff] }
  0x3a   : > { %1482 = vmatmul.mubr.msk.bf16.gmra.mxu0 %vm713_vm1, %v1576_v41  ;;  %1514 = vmatmul.mubr.msk.bf16.gmra.mxu1 %vm713_vm1, %v1582_v43 }
  0x3b   : > { %1485 = vmatprep.mubr.msk.bf16.mxu0 %vm713_vm1, %v1579_v42  ;;  %1517 = vmatprep.mubr.msk.bf16.mxu1 %vm713_vm1, %v1585_v44 }
  0x42   : > { %1486 = vmatmul.mubr.msk.bf16.gmra.mxu0 %vm713_vm1, %v1580_v45  ;;  %1518 = vmatmul.mubr.msk.bf16.gmra.mxu1 %vm713_vm1, %v1586_v47 }
  0x43   : > { %1489 = vmatprep.mubr.msk.bf16.mxu0 %vm713_vm1, %v1583_v46  ;;  %1521 = vmatprep.mubr.msk.bf16.mxu1 %vm713_vm1, %v1589_v48 }
  0x4a   : > { %1490 = vmatmul.mubr.msk.bf16.gmra.mxu0 %vm713_vm1, %v1584_v49  ;;  %1522 = vmatmul.mubr.msk.bf16.gmra.mxu1 %vm713_vm1, %v1590_v51 }
  0x4b   : > { %1493 = vmatprep.mubr.msk.bf16.mxu0 %vm713_vm1, %v1587_v50  ;;  %1525 = vmatprep.mubr.msk.bf16.mxu1 %vm713_vm1, %v1593_v52 }
  0x52   : > { %1494 = vmatmul.mubr.msk.bf16.gmra.mxu0 %vm713_vm1, %v1588_v53  ;;  %1526 = vmatmul.mubr.msk.bf16.gmra.mxu1 %vm713_vm1, %v1594_v55 }
  0x53   : > { %1497 = vmatprep.mubr.msk.bf16.mxu0 %vm713_vm1, %v1591_v54  ;;  %1529 = vmatprep.mubr.msk.bf16.mxu1 %vm713_vm1, %v1597_v56 }
  0x5a   : > { %1498 = vmatmul.mubr.msk.bf16.gmra.mxu0 %vm713_vm1, %v1592_v57  ;;  %1530 = vmatmul.mubr.msk.bf16.gmra.mxu1 %vm713_vm1, %v1598_v59 }
  0x5b   : > { %1501 = vmatprep.mubr.msk.bf16.mxu0 %vm713_vm1, %v1595_v58  ;;  %1533 = vmatprep.mubr.msk.bf16.mxu1 %vm713_vm1, %v1601_v60 }
  0x62   : > { %1502 = vmatmul.mubr.msk.bf16.gmra.mxu0 %vm713_vm1, %v1596_v61  ;;  %1534 = vmatmul.mubr.msk.bf16.gmra.mxu1 %vm713_vm1, %v1602_v63 }
  0x63   : > { %1505 = vmatprep.mubr.msk.bf16.mxu0 %vm713_vm1, %v1599_v62  ;;  %1537 = vmatprep.mubr.msk.bf16.mxu1 %vm713_vm1, %v1603_v0 }
  0x6a   : > { %1506 = vmatmul.mubr.msk.bf16.gmra.mxu0 %vm713_vm1, %v1600_v1  ;;  %1538 = vmatmul.mubr.msk.bf16.gmra.mxu1 %vm713_vm1, %v1604_v2 }
  0xf2   : > { %v1479_v3 = vpop.f32.mrf.mxu0  ;;  %v1511_v4 = vpop.f32.mrf.mxu1 }
  0xf3   : > { %v857_v19 = vadd.f32 %v1479_v3, %v1829_v15  ;;  %v985_v21 = vadd.f32 %v1511_v4, %v1829_v15 }
  0xf4   : > { %v848_v5 = vpop.f32.mrf.mxu0  ;;  %v976_v6 = vpop.f32.mrf.mxu1 }
  0xf5   : > { %v849_v23 = vadd.f32 %v1829_v15, %v848_v5  ;;  %v1105_v27 = vmax.f32 %v857_v19, 0.0  ;;  %v977_v29 = vadd.f32 %v1829_v15, %v976_v6  ;;  %v1137_v32 = vmax.f32 %v985_v21, 0.0 }
  0xf6   : > { %v1480_v7 = vpop.f32.mrf.mxu0  ;;  %v1512_v8 = vpop.f32.mrf.mxu1 }
  0xf7   : > { %v860_v28 = vadd.f32 %v1480_v7, %v1829_v15  ;;  %v988_v33 = vadd.f32 %v1512_v8, %v1829_v15  ;;  %v1103_v35 = vmax.f32 %v849_v23, 0.0  ;;  %v1843_v42 = vsel %vm1167_vm2, %v1105_v27, -inf }
  0xf8   : > { %v851_v9 = vpop.f32.mrf.mxu0  ;;  %v979_v10 = vpop.f32.mrf.mxu1  ;;  %v1135_v44 = vmax.f32 %v977_v29, 0.0  ;;  %v1847_v48 = vsel %vm1167_vm2, %v1137_v32, -inf }
  0xf9   : > { %v852_v36 = vadd.f32 %v1829_v15, %v851_v9  ;;  %v980_v37 = vadd.f32 %v1829_v15, %v979_v10  ;;  %v1106_v43 = vmax.f32 %v860_v28, 0.0  ;;  %v1138_v50 = vmax.f32 %v988_v33, 0.0 }
  0xfa   : > { %v1483_v11 = vpop.f32.mrf.mxu0  ;;  %v1515_v12 = vpop.f32.mrf.mxu1  ;;  %v1851_v52 = vsel %vm1167_vm2, %v1103_v35, -inf  ;;  %v1861_v63 = vsel %vm1167_vm2, %v1135_v44, -inf }
  0xfb   : > { %v873_v25 = vadd.f32 %v1483_v11, %v1829_v15  ;;  %v1001_v45 = vadd.f32 %v1515_v12, %v1829_v15  ;;  %v1104_v53 = vmax.f32 %v852_v36, 0.0  ;;  %v1136_v54 = vmax.f32 %v980_v37, 0.0 }
  0xfc   : > { %v864_v13 = vpop.f32.mrf.mxu0  ;;  %v992_v14 = vpop.f32.mrf.mxu1  ;;  %v1858_v62 = vsel %vm1167_vm2, %v1106_v43, -inf  ;;  %v1866_v5 = vsel %vm1167_vm2, %v1138_v50, -inf }
  0xfd   : > { %v865_v31 = vadd.f32 %v1829_v15, %v864_v13  ;;  %v1109_v39 = vmax.f32 %v873_v25, 0.0  ;;  %v993_v55 = vadd.f32 %v1829_v15, %v992_v14  ;;  %v1141_v0 = vmax.f32 %v1001_v45, 0.0 }
  0xfe   : > { %v1484_v16 = vpop.f32.mrf.mxu0  ;;  %v1516_v17 = vpop.f32.mrf.mxu1  ;;  %v1870_v8 = vsel %vm1167_vm2, %v1104_v53, -inf  ;;  %v1874_v10 = vsel %vm1167_vm2, %v1136_v54, -inf }
  0xff   : > { %v876_v40 = vadd.f32 %v1484_v16, %v1829_v15  ;;  %v1107_v47 = vmax.f32 %v865_v31, 0.0  ;;  %v1231_v57 = vsel %vm1167_vm2, %v1109_v39, -inf  ;;  %v1004_v60 = vadd.f32 %v1516_v17, %v1829_v15 }
 0x100   : > { %v867_v18 = vpop.f32.mrf.mxu0  ;;  %v995_v20 = vpop.f32.mrf.mxu1  ;;  %v1232_v9 = vmax.f32 %v1843_v42, %v1231_v57  ;;  %v1139_v11 = vmax.f32 %v993_v55, 0.0 }
 0x101   : > { %v868_v49 = vadd.f32 %v1829_v15, %v867_v18  ;;  %v1110_v58 = vmax.f32 %v876_v40, 0.0  ;;  %v996_v1 = vadd.f32 %v1829_v15, %v995_v20  ;;  %v1169_v3 = vsel %vm1167_vm2, %v1107_v47, -inf }
 0x102   : > { %v1487_v22 = vpop.f32.mrf.mxu0  ;;  %v1519_v24 = vpop.f32.mrf.mxu1  ;;  %v1142_v17 = vmax.f32 %v1004_v60, 0.0  ;;  %v1170_v19 = vmax.f32 %v1851_v52, %v1169_v3  ;;  %v1880_v20 = vsel %vm1167_vm2, %v1141_v0, -inf  ;;  %v1888_v32 = vsel %vm1167_vm2, %v1139_v11, -inf }
 0x103   : > { %v889_v59 = vadd.f32 %v1487_v22, %v1829_v15  ;;  %v1108_v4 = vmax.f32 %v868_v49, 0.0  ;;  %v1262_v13 = vsel %vm1167_vm2, %v1110_v58, -inf  ;;  %v1140_v21 = vmax.f32 %v996_v1, 0.0 }
 0x104   : > { %v880_v26 = vpop.f32.mrf.mxu0  ;;  %v1008_v30 = vpop.f32.mrf.mxu1  ;;  %v1017_v22 = vadd.f32 %v1519_v24, %v1829_v15  ;;  %v1263_v31 = vmax.f32 %v1858_v62, %v1262_v13  ;;  %v1894_v37 = vsel %vm1167_vm2, %v1142_v17, -inf }
 0x105   : > { %v881_v6 = vadd.f32 %v1829_v15, %v880_v26  ;;  %v1113_v14 = vmax.f32 %v889_v59, 0.0  ;;  %v1200_v25 = vsel %vm1167_vm2, %v1108_v4, -inf  ;;  %v1009_v28 = vadd.f32 %v1829_v15, %v1008_v30 }
 0x106   : > { %v1488_v34 = vpop.f32.mrf.mxu0  ;;  %v1520_v38 = vpop.f32.mrf.mxu1  ;;  %v1201_v40 = vmax.f32 %v1870_v8, %v1200_v25  ;;  %v1145_v42 = vmax.f32 %v1017_v22, 0.0 }
 0x107   : > { %v892_v16 = vadd.f32 %v1488_v34, %v1829_v15  ;;  %v1111_v26 = vmax.f32 %v881_v6, 0.0  ;;  %v1020_v34 = vadd.f32 %v1520_v38, %v1829_v15  ;;  %v1233_v24 = vsel %vm1167_vm2, %v1113_v14, -inf }
 0x108   : > { %v883_v41 = vpop.f32.mrf.mxu0  ;;  %v1011_v46 = vpop.f32.mrf.mxu1  ;;  %v1143_v49 = vmax.f32 %v1009_v28, 0.0  ;;  %v1913_v62 = vsel %vm1167_vm2, %v1145_v42, -inf }
 0x109   : > { %v884_v27 = vadd.f32 %v1829_v15, %v883_v41  ;;  %v1114_v36 = vmax.f32 %v892_v16, 0.0  ;;  %v1899_v41 = vsel %vm1167_vm2, %v1140_v21, -inf  ;;  %v1012_v43 = vadd.f32 %v1829_v15, %v1011_v46 }
 0x10a   : > { %v1491_v51 = vpop.f32.mrf.mxu0  ;;  %v1523_v56 = vpop.f32.mrf.mxu1  ;;  %v1171_v38 = vsel %vm1167_vm2, %v1111_v26, -inf  ;;  %v1146_v53 = vmax.f32 %v1020_v34, 0.0  ;;  %v1918_v6 = vsel %vm1167_vm2, %v1143_v49, -inf }
 0x10b   : > { %v905_v33 = vadd.f32 %v1491_v51, %v1829_v15  ;;  %v1112_v45 = vmax.f32 %v884_v27, 0.0  ;;  %v1904_v51 = vmax.f32 %v1232_v9, %v1233_v24  ;;  %v1033_v54 = vadd.f32 %v1523_v56, %v1829_v15 }
 0x10c   : > { %v896_v61 = vpop.f32.mrf.mxu0  ;;  %v1024_v2 = vpop.f32.mrf.mxu1  ;;  %v1264_v57 = vsel %vm1167_vm2, %v1114_v36, -inf  ;;  %v1144_v0 = vmax.f32 %v1012_v43, 0.0  ;;  %v1925_v11 = vsel %vm1167_vm2, %v1146_v53, -inf }
 0x10d   : > { %v897_v39 = vadd.f32 %v1829_v15, %v896_v61  ;;  %v1117_v52 = vmax.f32 %v905_v33, 0.0  ;;  %v1025_v59 = vadd.f32 %v1829_v15, %v1024_v2  ;;  %v1910_v61 = vmax.f32 %v1170_v19, %v1171_v38 }
 0x10e   : > { %v1492_v7 = vpop.f32.mrf.mxu0  ;;  %v1524_v12 = vpop.f32.mrf.mxu1  ;;  %v1202_v56 = vsel %vm1167_vm2, %v1112_v45, -inf  ;;  %v1921_v2 = vmax.f32 %v1263_v31, %v1264_v57  ;;  %v1149_v13 = vmax.f32 %v1033_v54, 0.0  ;;  %v1934_v22 = vsel %vm1167_vm2, %v1144_v0, -inf }
 0x10f   : > { %v908_v47 = vadd.f32 %v1492_v7, %v1829_v15  ;;  %v1115_v58 = vmax.f32 %v897_v39, 0.0  ;;  %v1036_v1 = vadd.f32 %v1524_v12, %v1829_v15  ;;  %v1235_v9 = vsel %vm1167_vm2, %v1117_v52, -inf }
 0x110   : > { %v899_v18 = vpop.f32.mrf.mxu0  ;;  %v1027_v23 = vpop.f32.mrf.mxu1  ;;  %v1147_v17 = vmax.f32 %v1025_v59, 0.0  ;;  %v1931_v21 = vmax.f32 %v1201_v40, %v1202_v56  ;;  %v1945_v36 = vsel %vm1167_vm2, %v1149_v13, -inf }
 0x111   : > { %v900_v46 = vadd.f32 %v1829_v15, %v899_v18  ;;  %v1118_v4 = vmax.f32 %v908_v47, 0.0  ;;  %v1173_v12 = vsel %vm1167_vm2, %v1115_v58, -inf  ;;  %v1028_v18 = vadd.f32 %v1829_v15, %v1027_v23 }
 0x112   : > { %v1495_v29 = vpop.f32.mrf.mxu0  ;;  %v1527_v35 = vpop.f32.mrf.mxu1  ;;  %v1150_v26 = vmax.f32 %v1036_v1, 0.0  ;;  %v1236_v23 = vmax.f32 %v1904_v51, %v1235_v9  ;;  %v1174_v24 = vmax.f32 %v1910_v61, %v1173_v12  ;;  %v1952_v42 = vsel %vm1167_vm2, %v1147_v17, -inf }
 0x113   : > { %v921_v7 = vadd.f32 %v1495_v29, %v1829_v15  ;;  %v1116_v16 = vmax.f32 %v900_v46, 0.0  ;;  %v1266_v28 = vsel %vm1167_vm2, %v1118_v4, -inf  ;;  %v1049_v33 = vadd.f32 %v1527_v35, %v1829_v15 }
 0x114   : > { %v912_v30 = vpop.f32.mrf.mxu0  ;;  %v1040_v44 = vpop.f32.mrf.mxu1  ;;  %v1148_v43 = vmax.f32 %v1028_v18, 0.0  ;;  %v1267_v45 = vmax.f32 %v1921_v2, %v1266_v28  ;;  %v1957_v49 = vsel %vm1167_vm2, %v1150_v26, -inf }
 0x115   : > { %v913_v25 = vadd.f32 %v1829_v15, %v912_v30  ;;  %v1121_v29 = vmax.f32 %v921_v7, 0.0  ;;  %v1204_v40 = vsel %vm1167_vm2, %v1116_v16, -inf  ;;  %v1041_v35 = vadd.f32 %v1829_v15, %v1040_v44 }
 0x116   : > { %v1496_v50 = vpop.f32.mrf.mxu0  ;;  %v1528_v55 = vpop.f32.mrf.mxu1  ;;  %v1153_v54 = vmax.f32 %v1049_v33, 0.0  ;;  %v1205_v44 = vmax.f32 %v1931_v21, %v1204_v40  ;;  %v1970_v0 = vsel %vm1167_vm2, %v1148_v43, -inf }
 0x117   : > { %v924_v31 = vadd.f32 %v1496_v50, %v1829_v15  ;;  %v1119_v47 = vmax.f32 %v913_v25, 0.0  ;;  %v1237_v52 = vsel %vm1167_vm2, %v1121_v29, -inf  ;;  %v1052_v57 = vadd.f32 %v1528_v55, %v1829_v15 }
 0x118   : > { %v915_v60 = vpop.f32.mrf.mxu0  ;;  %v1043_v3 = vpop.f32.mrf.mxu1  ;;  %v1151_v56 = vmax.f32 %v1041_v35, 0.0  ;;  %v1238_v55 = vmax.f32 %v1236_v23, %v1237_v52  ;;  %v1980_v16 = vsel %vm1167_vm2, %v1153_v54, -inf }
 0x119   : > { %v916_v39 = vadd.f32 %v1829_v15, %v915_v60  ;;  %v1122_v53 = vmax.f32 %v924_v31, 0.0  ;;  %v1044_v4 = vadd.f32 %v1829_v15, %v1043_v3  ;;  %v1154_v18 = vmax.f32 %v1052_v57, 0.0 }
 0x11a   : > { %v1499_v8 = vpop.f32.mrf.mxu0  ;;  %v1927_v14 = vpop.f32.mrf.mxu1  ;;  %v1988_v33 = vsel %vm1167_vm2, %v1151_v56, -inf }
 0x11b   : > { %v937_v50 = vadd.f32 %v1499_v8, %v1829_v15  ;;  %v1120_v46 = vmax.f32 %v916_v39, 0.0  ;;  %v1175_v8 = vsel %vm1167_vm2, %v1119_v47, -inf  ;;  %v1268_v12 = vsel %vm1167_vm2, %v1122_v53, -inf }
 0x11c   : > { %v928_v19 = vpop.f32.mrf.mxu0  ;;  %v1937_v27 = vpop.f32.mrf.mxu1  ;;  %v1176_v29 = vmax.f32 %v1174_v24, %v1175_v8  ;;  %v1269_v39 = vmax.f32 %v1267_v45, %v1268_v12  ;;  %v1065_v24 = vadd.f32 %v1927_v14, %v1829_v15 }
 0x11d   : > { %v929_v59 = vadd.f32 %v1829_v15, %v928_v19  ;;  %v1125_v2 = vmax.f32 %v937_v50, 0.0  ;;  %v1206_v3 = vsel %vm1167_vm2, %v1120_v46, -inf  ;;  %v1993_v50 = vsel %vm1167_vm2, %v1154_v18, -inf }
 0x11e   : > { %v1500_v34 = vpop.f32.mrf.mxu0  ;;  %v1948_v30 = vpop.f32.mrf.mxu1 }
 0x11f   : > { %v940_v1 = vadd.f32 %v1500_v34, %v1829_v15  ;;  %v1123_v21 = vmax.f32 %v929_v59, 0.0  ;;  %v1152_v34 = vmax.f32 %v1044_v4, 0.0  ;;  %v1239_v40 = vsel %vm1167_vm2, %v1125_v2, -inf }
 0x120   : > { %v931_v38 = vpop.f32.mrf.mxu0  ;;  %v1960_v51 = vpop.f32.mrf.mxu1  ;;  %v1240_v46 = vmax.f32 %v1238_v55, %v1239_v40  ;;  %v1157_v55 = vmax.f32 %v1065_v24, 0.0 }
 0x121   : > { %v932_v17 = vadd.f32 %v1829_v15, %v931_v38  ;;  %v1126_v31 = vmax.f32 %v940_v1, 0.0  ;;  %v1207_v38 = vmax.f32 %v1205_v44, %v1206_v3  ;;  %v1177_v54 = vsel %vm1167_vm2, %v1123_v21, -inf }
 0x122   : > { %v1503_v58 = vpop.f32.mrf.mxu0  ;;  %v1967_v61 = vpop.f32.mrf.mxu1  ;;  %v2004_v59 = vsel %vm1167_vm2, %v1152_v34, -inf  ;;  %v1178_v8 = vmax.f32 %v1176_v29, %v1177_v54  ;;  %v1068_v54 = vadd.f32 %v1948_v30, %v1829_v15 }
 0x123   : > { %v953_v60 = vadd.f32 %v1503_v58, %v1829_v15  ;;  %v1124_v47 = vmax.f32 %v932_v17, 0.0  ;;  %v1270_v44 = vsel %vm1167_vm2, %v1126_v31, -inf }
 0x124   : > { %v944_v7 = vpop.f32.mrf.mxu0  ;;  %v1976_v13 = vpop.f32.mrf.mxu1  ;;  %v1271_v21 = vmax.f32 %v1269_v39, %v1270_v44 }
 0x125   : > { %v945_v9 = vadd.f32 %v1829_v15, %v944_v7  ;;  %v1129_v25 = vmax.f32 %v953_v60, 0.0  ;;  %v1057_v60 = vadd.f32 %v1829_v15, %v1937_v27  ;;  %v1208_v2 = vsel %vm1167_vm2, %v1124_v47, -inf }
 0x126   : > { %v1504_v19 = vpop.f32.mrf.mxu0  ;;  %v1985_v28 = vpop.f32.mrf.mxu1 }
 0x127   : > { %v956_v26 = vadd.f32 %v1504_v19, %v1829_v15  ;;  %v1127_v43 = vmax.f32 %v945_v9, 0.0  ;;  %v1241_v45 = vsel %vm1167_vm2, %v1129_v25, -inf }
 0x128   : > { %v947_v23 = vpop.f32.mrf.mxu0  ;;  %v1997_v53 = vpop.f32.mrf.mxu1  ;;  %v1242_v9 = vmax.f32 %v1240_v46, %v1241_v45  ;;  %v1081_v45 = vadd.f32 %v1967_v61, %v1829_v15 }
 0x129   : > { %v948_v35 = vadd.f32 %v1829_v15, %v947_v23  ;;  %v1130_v57 = vmax.f32 %v956_v26, 0.0  ;;  %v1179_v1 = vsel %vm1167_vm2, %v1127_v43, -inf  ;;  %v1155_v26 = vmax.f32 %v1057_v60, 0.0 }
 0x12a   : > { %v1507_v52 = vpop.f32.mrf.mxu0  ;;  %v1539_v17 = vpop.f32.mrf.mxu1  ;;  %v1180_v25 = vmax.f32 %v1178_v8, %v1179_v1  ;;  %v1158_v8 = vmax.f32 %v1068_v54, 0.0 }
 0x12b   : > { %v969_v58 = vadd.f32 %v1507_v52, %v1829_v15  ;;  %v1128_v56 = vmax.f32 %v948_v35, 0.0  ;;  %v1272_v18 = vsel %vm1167_vm2, %v1130_v57, -inf  ;;  %v1209_v35 = vmax.f32 %v1207_v38, %v1208_v2 }
 0x12c   : > { %v960_v14 = vpop.f32.mrf.mxu0  ;;  %v1273_v47 = vmax.f32 %v1271_v21, %v1272_v18  ;;  %v1088_v52 = vpop.f32.mrf.mxu1  ;;  %v1097_v61 = vadd.f32 %v1539_v17, %v1829_v15  ;;  %v1161_v2 = vmax.f32 %v1081_v45, 0.0 }
 0x12d   : > { %v1133_v4 = vmax.f32 %v969_v58, 0.0  ;;  %v961_v7 = vadd.f32 %v1829_v15, %v960_v14  ;;  %v1210_v29 = vsel %vm1167_vm2, %v1128_v56, -inf  ;;  %v1060_v14 = vadd.f32 %v1829_v15, %v1960_v51 }
 0x12e   : > { %v1508_v12 = vpop.f32.mrf.mxu0  ;;  %v1211_v46 = vmax.f32 %v1209_v35, %v1210_v29  ;;  %v1073_v51 = vadd.f32 %v1829_v15, %v1976_v13  ;;  %v1165_v17 = vmax.f32 %v1097_v61, 0.0  ;;  %v1089_v18 = vadd.f32 %v1829_v15, %v1088_v52 }
 0x12f   : > { %v1243_v19 = vsel %vm1167_vm2, %v1133_v4, -inf  ;;  %v1131_v27 = vmax.f32 %v961_v7, 0.0  ;;  %v972_v3 = vadd.f32 %v1508_v12, %v1829_v15  ;;  %v1540_v4 = vpop.f32.mrf.mxu1  ;;  %v1193_v7 = vsel %vm1167_vm2, %v1155_v26, -inf }
 0x130   : > { %v1244_v31 = vmax.f32 %v1242_v9, %v1243_v19  ;;  %v963_v34 = vpop.f32.mrf.mxu0  ;;  %v1257_v19 = vsel %vm1167_vm2, %v1161_v2, -inf  ;;  %v1163_v26 = vmax.f32 %v1089_v18, 0.0 }
 0x131   : > { %v1181_v23 = vsel %vm1167_vm2, %v1131_v27, -inf  ;;  %v1134_v40 = vmax.f32 %v972_v3, 0.0  ;;  %v964_v43 = vadd.f32 %v1829_v15, %v963_v34  ;;  %v1159_v27 = vmax.f32 %v1073_v51, 0.0 }
 0x132   : > { %v1246_v24 = vmax.f32 %v1244_v31, %v1847_v48  ;;  %v1182_v39 = vmax.f32 %v1180_v25, %v1181_v23  ;;  %v1255_v48 = vsel %vm1167_vm2, %v1157_v55, -inf  ;;  %v1076_v3 = vadd.f32 %v1829_v15, %v1997_v53 }
 0x133   : > { %v1274_v57 = vsel %vm1167_vm2, %v1134_v40, -inf  ;;  %v1132_v58 = vmax.f32 %v964_v43, 0.0  ;;  %v1286_v40 = vsel %vm1167_vm2, %v1158_v8, -inf }
 0x134   : > { %v1248_v44 = vmax.f32 %v1246_v24, %v1880_v20  ;;  %v1184_v60 = vmax.f32 %v1182_v39, %v1861_v63  ;;  %v1275_v38 = vmax.f32 %v1273_v47, %v1274_v57 }
 0x135   : > { %v1212_v30 = vsel %vm1167_vm2, %v1132_v58, -inf }
 0x136   : > { %v1250_v1 = vmax.f32 %v1248_v44, %v1913_v62  ;;  %v1186_v56 = vmax.f32 %v1184_v60, %v1888_v32  ;;  %v1277_v20 = vmax.f32 %v1275_v38, %v1866_v5  ;;  %v1213_v63 = vmax.f32 %v1211_v46, %v1212_v30 }
 0x137   : > { %v1156_v5 = vmax.f32 %v1060_v14, 0.0  ;;  %v1084_v32 = vadd.f32 %v1985_v28, %v1829_v15  ;;  %v1100_v28 = vadd.f32 %v1540_v4, %v1829_v15 }
 0x138   : > { %v1188_v9 = vmax.f32 %v1186_v56, %v1918_v6  ;;  %v1252_v55 = vmax.f32 %v1250_v1, %v1945_v36  ;;  %v1279_v12 = vmax.f32 %v1277_v20, %v1894_v37  ;;  %v1215_v62 = vmax.f32 %v1213_v63, %v1874_v10  ;;  %v1091_v10 = vpop.f32.mrf.mxu1 }
 0x139   : > { %v1092_v31 = vadd.f32 %v1829_v15, %v1091_v10  ;;  %v1224_v24 = vsel %vm1167_vm2, %v1156_v5, -inf }
 0x13a   : > { %v1254_v13 = vmax.f32 %v1252_v55, %v1980_v16  ;;  %v1281_v6 = vmax.f32 %v1279_v12, %v1925_v11  ;;  %v1190_v36 = vmax.f32 %v1188_v9, %v1952_v42  ;;  %v1217_v37 = vmax.f32 %v1215_v62, %v1899_v41 }
 0x13b   : > { %v1162_v42 = vmax.f32 %v1084_v32, 0.0  ;;  %v1259_v41 = vsel %vm1167_vm2, %v1165_v17, -inf  ;;  %v1164_v39 = vmax.f32 %v1092_v31, 0.0 }
 0x13c   : > { %v1256_v21 = vmax.f32 %v1254_v13, %v1255_v48  ;;  %v1192_v25 = vmax.f32 %v1190_v36, %v1988_v33  ;;  %v1219_v16 = vmax.f32 %v1217_v37, %v1934_v22  ;;  %v1283_v11 = vmax.f32 %v1281_v6, %v1957_v49 }
 0x13d   : > { %v1195_v33 = vsel %vm1167_vm2, %v1159_v27, -inf  ;;  %v1160_v22 = vmax.f32 %v1076_v3, 0.0  ;;  %v1166_v49 = vmax.f32 %v1100_v28, 0.0  ;;  %v1228_v44 = vsel %vm1167_vm2, %v1164_v39, -inf }
 0x13e   : > { %v1258_v34 = vmax.f32 %v1256_v21, %v1257_v19  ;;  %v1194_v29 = vmax.f32 %v1192_v25, %v1193_v7  ;;  %v1285_v53 = vmax.f32 %v1283_v11, %v1993_v50  ;;  %v1221_v23 = vmax.f32 %v1219_v16, %v1970_v0 }
 0x13f   : > { %v1288_v50 = vsel %vm1167_vm2, %v1162_v42, -inf  ;;  %v1197_v0 = vsel %vm1167_vm2, %v1163_v26, -inf  ;;  %v1226_v57 = vsel %vm1167_vm2, %v1160_v22, -inf  ;;  %v1290_v58 = vsel %vm1167_vm2, %v1166_v49, -inf }
 0x140   : > { %v1196_v43 = vmax.f32 %v1194_v29, %v1195_v33  ;;  %v1287_v35 = vmax.f32 %v1285_v53, %v1286_v40  ;;  %v1223_v15 = vmax.f32 %v1221_v23, %v2004_v59  ;;  %v1260_v47 = vmax.f32 %v1258_v34, %v1259_v41 }
 0x142   : > { %v1289_v52 = vmax.f32 %v1287_v35, %v1288_v50  ;;  %v1225_v54 = vmax.f32 %v1223_v15, %v1224_v24  ;;  %1294 = vst.msk [vmem:[%s467_s14 + $0x10] sm:$0xff] %vm1167_vm2, %v1260_v47  ;;  %v1198_v45 = vmax.f32 %v1196_v43, %v1197_v0 }
 0x144   : > { %v1227_v46 = vmax.f32 %v1225_v54, %v1226_v57  ;;  %1292 = vst.msk [vmem:[%s467_s14] sm:$0xff] %vm1167_vm2, %v1198_v45  ;;  %v1291_v59 = vmax.f32 %v1289_v52, %v1290_v58 }
 0x146   : > { %1295 = vst.msk [vmem:[%s467_s14 + $0x18] sm:$0xff] %vm1167_vm2, %v1291_v59  ;;  %v1229_v60 = vmax.f32 %v1227_v46, %v1228_v44 }
 0x148   : > { %1293 = vst.msk [vmem:[%s467_s14 + $0x8] sm:$0xff] %vm1167_vm2, %v1229_v60 }
 0x149 PF: > { %p10_p9 = scmp.ge.s32.totalorder %s1666_s16, 10   ;;  %s2099_s12 = smov %s1623_s13 }
 0x14a   : > { %s2100_s13 = smov %s1675_s19  ;;  %s2101_s14 = smov %s1666_s16 }
 0x14b   :  { %12 = sbr.rel (!%p10_p9) target bundleno = 2 (0x2), region = 108 }

</bundles_post_ra>
